<compile_context>
chip_gen: v5e
topology: v5e:2x2
jax: 0.10.0
libtpu: 0.0.40
codegen_flags: <defaults>
</compile_context>

<pallas_src>
import jax
import jax.numpy as jnp
from jax.experimental import pallas as pl
from jax.experimental.pallas import tpu as pltpu


def _vmem_capacity_bytes():
    """Physical VMEM of the current TPU generation (conservative fallback)."""
    try:
        cap = int(pltpu.get_tpu_info().vmem_capacity_bytes)
        if cap > 0:
            return cap
    except Exception:
        pass
    return 64 * 1024 * 1024  # v7x-sized fallback: safe on every generation


def _pick_batch_tile(B, C, H, W, itemsize, cap):
    """Largest divisor of B that (a) keeps >=4 grid steps when B permits
    (software pipelining + both v7x TensorCores) and (b) fits ~0.75*VMEM
    counting double-buffered inputs, the precomputed mask and f32 temporaries."""
    if H % 8 != 0:
        return 1  # keep the in-kernel (Bt*H, W) fold a pure squeeze
    step_cap = max(1, B // 4)        # >=4 steps for B>=4, >=2 steps for B>=2
    budget = cap // 8                # per-input per-buffer block budget
    per_sample_in = C * H * W * itemsize
    per_sample_f32 = H * W * 4
    best = 1
    for cand in range(1, step_cap + 1):
        if B % cand != 0:
            continue
        if cand * per_sample_in > budget:
            continue
        need = (4 * cand * per_sample_in      # 2 inputs x 2 pipeline buffers
                + 2 * cand * per_sample_f32   # validity mask (constant block)
                + 6 * cand * per_sample_f32   # live f32 stencil temporaries
                + 2 * 8 * 128 * 4)            # output block
        if need <= int(cap * 0.75):
            best = cand
    return best


def fast_grad_loss(im1, im2, batch_reduction="mean"):
    """Pallas implementation of FastGradLoss.forward (batch_reduction='mean')."""
    assert im1.shape == im2.shape and im1.ndim == 4
    B, C, H, W = im1.shape
    assert H >= 3 and W >= 3, "3x3 VALID conv needs H, W >= 3"
    # TODO(synk): batch_reduction != 'mean' not implemented.
    assert batch_reduction == "mean"

    itemsize = im1.dtype.itemsize
    cap = _vmem_capacity_bytes()
    Bt = _pick_batch_tile(B, C, H, W, itemsize, cap)
    nb = B // Bt
    R = Bt * H  # batch folded into the sublane axis inside the kernel
    tile_reduce = (R % 8 == 0) and (W % 128 == 0)

    # VALID-conv interior mask, precomputed once in the wrapper. Constant
    # index_map -> DMA'd a single time; one multiply/element in the kernel.
    hh = jnp.arange(R, dtype=jnp.int32) % H
    row_ok = (hh >= 1) & (hh <= H - 2)
    ww = jnp.arange(W, dtype=jnp.int32)
    col_ok = (ww >= 1) & (ww <= W - 2)
    mask = (row_ok[:, None] & col_ok[None, :]).astype(jnp.float32)

    def kernel(im1_ref, im2_ref, mask_ref, out_ref):
        # ---- fused channel SUM of the difference (1/C folded into wrapper) ---
        d = (im1_ref[:, 0, :, :].astype(jnp.float32)
             - im2_ref[:, 0, :, :].astype(jnp.float32))
        for c in range(1, C):
            d = d + (im1_ref[:, c, :, :].astype(jnp.float32)
                     - im2_ref[:, c, :, :].astype(jnp.float32))
        d = d.reshape(R, W)  # (Bt,H,W) -> (Bt*H,W): free relabel (H%8==0 or Bt==1)

        # ---- 3x3 stencils via +/-1 rolls (centered form, abs-invariant) ------
        # kx path first so its temporaries are dead before the ky path goes live.
        cw = pltpu.roll(d, shift=1, axis=1) - pltpu.roll(d, shift=W - 1, axis=1)
        gx = pltpu.roll(cw, shift=1, axis=0) + cw + pltpu.roll(cw, shift=R - 1, axis=0)
        acc = jnp.abs(gx)
        # ky path
        rw = pltpu.roll(d, shift=1, axis=0) - pltpu.roll(d, shift=R - 1, axis=0)
        gy = pltpu.roll(rw, shift=1, axis=1) + rw + pltpu.roll(rw, shift=W - 1, axis=1)
        acc = (acc + jnp.abs(gy)) * mask_ref[...]

        # ---- lane-dense (8,128) partial tile per grid step --------------------
        if tile_reduce:
            # VALU-only: fold aligned 128-lane chunks, then aligned 8-row blocks.
            lane = acc[:, 0:128]
            for c0 in range(128, W, 128):
                lane = lane + acc[:, c0:c0 + 128]              # (R, 128)
            tile = jnp.sum(lane.reshape(R // 8, 8, 128), axis=0)  # (8, 128)
            out_ref[...] = tile.reshape(1, 8, 128)
        else:
            out_ref[...] = jnp.full((1, 8, 128), jnp.sum(acc), dtype=jnp.float32)

    in_block_bytes = Bt * C * H * W * itemsize
    need = 4 * in_block_bytes + 2 * R * W * 4 + 6 * R * W * 4 + 2 * 8 * 128 * 4
    vmem_limit = int(min(max(int(1.3 * need), 16 * 1024 * 1024), int(cap * 0.75)))
    vmem_limit = max(vmem_limit, min(int(1.1 * need), cap))  # last-resort headroom

    partial = pl.pallas_call(
        kernel,
        out_shape=jax.ShapeDtypeStruct((nb, 8, 128), jnp.float32),
        grid_spec=pltpu.PrefetchScalarGridSpec(
            num_scalar_prefetch=0,
            grid=(nb,),
            in_specs=[
                pl.BlockSpec((Bt, C, H, W), lambda i: (i, 0, 0, 0)),
                pl.BlockSpec((Bt, C, H, W), lambda i: (i, 0, 0, 0)),
                pl.BlockSpec((R, W), lambda i: (0, 0)),
            ],
            out_specs=pl.BlockSpec((1, 8, 128), lambda i: (i, 0, 0)),
        ),
        compiler_params=pltpu.CompilerParams(
            dimension_semantics=("parallel",),  # no cross-step accumulation
            vmem_limit_bytes=vmem_limit,
        ),
    )(im1, im2, mask)

    total = jnp.sum(partial) if tile_reduce else jnp.sum(partial[:, 0, 0])
    # conv outputs are (H-2, W-2); l1_loss('mean') is a global mean; 1/C folded here.
    return total / (2.0 * float(B) * float(C) * float(H - 2) * float(W - 2))


def fast_grad_loss_reference(im1, im2):
    """Pure-JAX reference matching the PyTorch forward (batch_reduction='mean')."""
    kx = jnp.array([[1.0, 0.0, -1.0]] * 3, jnp.float32).reshape(1, 1, 3, 3)
    ky = jnp.array([[1.0, 1.0, 1.0], [0.0, 0.0, 0.0], [-1.0, -1.0, -1.0]],
                   jnp.float32).reshape(1, 1, 3, 3)
    g1 = jnp.mean(im1.astype(jnp.float32), axis=1, keepdims=True)
    g2 = jnp.mean(im2.astype(jnp.float32), axis=1, keepdims=True)

    def conv(x, k):
        return jax.lax.conv_general_dilated(
            x, k, window_strides=(1, 1), padding="VALID",
            dimension_numbers=("NCHW", "OIHW", "NCHW"))

    diff_x = jnp.mean(jnp.abs(conv(g1, kx) - conv(g2, kx)))
    diff_y = jnp.mean(jnp.abs(conv(g1, ky) - conv(g2, ky)))
    return (diff_x + diff_y) / 2.0


if __name__ == "__main__":
    key = jax.random.PRNGKey(0)
    k1, k2 = jax.random.split(key)

    # Small demo shape; W = 128 keeps the lane dimension native-width.
    B, C, H, W = 2, 3, 16, 128
    im1 = jax.random.normal(k1, (B, C, H, W), dtype=jnp.float32)
    im2 = jax.random.normal(k2, (B, C, H, W), dtype=jnp.float32)

    loss = jax.block_until_ready(fast_grad_loss(im1, im2))
    ref = jax.block_until_ready(fast_grad_loss_reference(im1, im2))
    assert jnp.allclose(loss, ref, rtol=2e-5, atol=1e-5), (loss, ref)

    print("KERNEL_OK")
</pallas_src>

<mosaic_0001>
module attributes {stable_mosaic.version = 11 : i64} {
  func.func @kernel(%arg0: i32, %arg1: memref<1x3x16x128xf32, #tpu.memory_space<vmem>>, %arg2: memref<1x3x16x128xf32, #tpu.memory_space<vmem>>, %arg3: memref<16x128xf32, #tpu.memory_space<vmem>>, %arg4: memref<1x8x128xf32, #tpu.memory_space<vmem>>) attributes {dimension_semantics = [#tpu.dimension_semantics<parallel>], iteration_bounds = array<i64: 2>, scalar_prefetch = 0 : i64, scratch_operands = 0 : i64, tpu.core_type = #tpu.core_type<tc>, window_params = [{transform_indices = @transform_0, window_bounds = array<i64: 1, 3, 16, 128>}, {transform_indices = @transform_1, window_bounds = array<i64: 1, 3, 16, 128>}, {pipeline_mode = #tpu.pipeline_mode<synchronous>, transform_indices = @transform_2, window_bounds = array<i64: 16, 128>}, {transform_indices = @transform_3, window_bounds = array<i64: 1, 8, 128>}]} {
    %c0 = arith.constant 0 : index
    %c0_0 = arith.constant 0 : index
    %c0_1 = arith.constant 0 : index
    %c0_2 = arith.constant 0 : index
    %0 = vector.load %arg1[%c0, %c0_0, %c0_1, %c0_2] : memref<1x3x16x128xf32, #tpu.memory_space<vmem>>, vector<1x1x16x128xf32>
    %1 = vector.shape_cast %0 : vector<1x1x16x128xf32> to vector<1x16x128xf32>
    %c0_3 = arith.constant 0 : index
    %c0_4 = arith.constant 0 : index
    %c0_5 = arith.constant 0 : index
    %c0_6 = arith.constant 0 : index
    %2 = vector.load %arg2[%c0_3, %c0_4, %c0_5, %c0_6] : memref<1x3x16x128xf32, #tpu.memory_space<vmem>>, vector<1x1x16x128xf32>
    %3 = vector.shape_cast %2 : vector<1x1x16x128xf32> to vector<1x16x128xf32>
    %4 = arith.subf %1, %3 : vector<1x16x128xf32>
    %c0_7 = arith.constant 0 : index
    %c1 = arith.constant 1 : index
    %c0_8 = arith.constant 0 : index
    %c0_9 = arith.constant 0 : index
    %5 = vector.load %arg1[%c0_7, %c1, %c0_8, %c0_9] : memref<1x3x16x128xf32, #tpu.memory_space<vmem>>, vector<1x1x16x128xf32>
    %6 = vector.shape_cast %5 : vector<1x1x16x128xf32> to vector<1x16x128xf32>
    %c0_10 = arith.constant 0 : index
    %c1_11 = arith.constant 1 : index
    %c0_12 = arith.constant 0 : index
    %c0_13 = arith.constant 0 : index
    %7 = vector.load %arg2[%c0_10, %c1_11, %c0_12, %c0_13] : memref<1x3x16x128xf32, #tpu.memory_space<vmem>>, vector<1x1x16x128xf32>
    %8 = vector.shape_cast %7 : vector<1x1x16x128xf32> to vector<1x16x128xf32>
    %9 = arith.subf %6, %8 : vector<1x16x128xf32>
    %10 = arith.addf %4, %9 : vector<1x16x128xf32>
    %c0_14 = arith.constant 0 : index
    %c2 = arith.constant 2 : index
    %c0_15 = arith.constant 0 : index
    %c0_16 = arith.constant 0 : index
    %11 = vector.load %arg1[%c0_14, %c2, %c0_15, %c0_16] : memref<1x3x16x128xf32, #tpu.memory_space<vmem>>, vector<1x1x16x128xf32>
    %12 = vector.shape_cast %11 : vector<1x1x16x128xf32> to vector<1x16x128xf32>
    %c0_17 = arith.constant 0 : index
    %c2_18 = arith.constant 2 : index
    %c0_19 = arith.constant 0 : index
    %c0_20 = arith.constant 0 : index
    %13 = vector.load %arg2[%c0_17, %c2_18, %c0_19, %c0_20] : memref<1x3x16x128xf32, #tpu.memory_space<vmem>>, vector<1x1x16x128xf32>
    %14 = vector.shape_cast %13 : vector<1x1x16x128xf32> to vector<1x16x128xf32>
    %15 = arith.subf %12, %14 : vector<1x16x128xf32>
    %16 = arith.addf %10, %15 : vector<1x16x128xf32>
    %17 = vector.shape_cast %16 : vector<1x16x128xf32> to vector<16x128xf32>
    %c1_i32 = arith.constant 1 : i32
    %18 = tpu.dynamic_rotate %17 by %c1_i32 dim 1 : vector<16x128xf32>, i32 -> vector<16x128xf32>
    %c127_i32 = arith.constant 127 : i32
    %19 = tpu.dynamic_rotate %17 by %c127_i32 dim 1 : vector<16x128xf32>, i32 -> vector<16x128xf32>
    %20 = arith.subf %18, %19 : vector<16x128xf32>
    %c1_i32_21 = arith.constant 1 : i32
    %21 = tpu.dynamic_rotate %20 by %c1_i32_21 dim 0 : vector<16x128xf32>, i32 -> vector<16x128xf32>
    %22 = arith.addf %21, %20 : vector<16x128xf32>
    %c15_i32 = arith.constant 15 : i32
    %23 = tpu.dynamic_rotate %20 by %c15_i32 dim 0 : vector<16x128xf32>, i32 -> vector<16x128xf32>
    %24 = arith.addf %22, %23 : vector<16x128xf32>
    %25 = math.absf %24 : vector<16x128xf32>
    %c1_i32_22 = arith.constant 1 : i32
    %26 = tpu.dynamic_rotate %17 by %c1_i32_22 dim 0 : vector<16x128xf32>, i32 -> vector<16x128xf32>
    %c15_i32_23 = arith.constant 15 : i32
    %27 = tpu.dynamic_rotate %17 by %c15_i32_23 dim 0 : vector<16x128xf32>, i32 -> vector<16x128xf32>
    %28 = arith.subf %26, %27 : vector<16x128xf32>
    %c1_i32_24 = arith.constant 1 : i32
    %29 = tpu.dynamic_rotate %28 by %c1_i32_24 dim 1 : vector<16x128xf32>, i32 -> vector<16x128xf32>
    %30 = arith.addf %29, %28 : vector<16x128xf32>
    %c127_i32_25 = arith.constant 127 : i32
    %31 = tpu.dynamic_rotate %28 by %c127_i32_25 dim 1 : vector<16x128xf32>, i32 -> vector<16x128xf32>
    %32 = arith.addf %30, %31 : vector<16x128xf32>
    %33 = math.absf %32 : vector<16x128xf32>
    %34 = arith.addf %25, %33 : vector<16x128xf32>
    %c0_26 = arith.constant 0 : index
    %c0_27 = arith.constant 0 : index
    %35 = vector.load %arg3[%c0_26, %c0_27] : memref<16x128xf32, #tpu.memory_space<vmem>>, vector<16x128xf32>
    %36 = arith.mulf %34, %35 : vector<16x128xf32>
    %37 = vector.shape_cast %36 : vector<16x128xf32> to vector<2x8x128xf32>
    %cst = arith.constant dense<0.000000e+00> : vector<8x128xf32>
    %38 = vector.multi_reduction <add>, %37, %cst [0] : vector<2x8x128xf32> to vector<8x128xf32>
    %39 = vector.shape_cast %38 : vector<8x128xf32> to vector<1x8x128xf32>
    %c0_28 = arith.constant 0 : index
    %c0_29 = arith.constant 0 : index
    %c0_30 = arith.constant 0 : index
    %40 = vector.load %arg4[%c0_28, %c0_29, %c0_30] : memref<1x8x128xf32, #tpu.memory_space<vmem>>, vector<1x8x128xf32>
    tpu.vector_store %arg4[%c0_28, %c0_29, %c0_30], %39 {strides = array<i32>} : memref<1x8x128xf32, #tpu.memory_space<vmem>>, vector<1x8x128xf32>,
    return
  }
  func.func @transform_0(%arg0: i32) -> (i32, i32, i32, i32) {
    %c0_i32 = arith.constant 0 : i32
    %c0_i32_0 = arith.constant 0 : i32
    %c0_i32_1 = arith.constant 0 : i32
    %c0_i32_2 = arith.constant 0 : i32
    return %arg0, %c0_i32, %c0_i32_0, %c0_i32_1 : i32, i32, i32, i32
  }
  func.func @transform_1(%arg0: i32) -> (i32, i32, i32, i32) {
    %c0_i32 = arith.constant 0 : i32
    %c0_i32_0 = arith.constant 0 : i32
    %c0_i32_1 = arith.constant 0 : i32
    %c0_i32_2 = arith.constant 0 : i32
    return %arg0, %c0_i32, %c0_i32_0, %c0_i32_1 : i32, i32, i32, i32
  }
  func.func @transform_2(%arg0: i32) -> (i32, i32) {
    %c0_i32 = arith.constant 0 : i32
    %c0_i32_0 = arith.constant 0 : i32
    %c0_i32_1 = arith.constant 0 : i32
    return %c0_i32, %c0_i32_0 : i32, i32
  }
  func.func @transform_3(%arg0: i32) -> (i32, i32, i32) {
    %c0_i32 = arith.constant 0 : i32
    %c0_i32_0 = arith.constant 0 : i32
    %c0_i32_1 = arith.constant 0 : i32
    return %arg0, %c0_i32, %c0_i32_0 : i32, i32, i32
  }
}

</mosaic_0001>

<bundles_post_ra>
// kernel: tpu_custom_call.1
= control target key start
LH: loop header
LB: loop body
LE: loop exit
PB: predicated region body
PF: predicated region fallthrough
CT: control target
= control target key end

     0   :  { %s915_s0 = inlined_call_operand.hbm [shape: f32[2,3,16,128], index: 0, kind: input, shape index: {}]   ;;  %s916_s1 = inlined_call_operand.hbm [shape: f32[2,3,16,128], index: 1, kind: input, shape index: {}]   ;;  %s917_s2 = inlined_call_operand.hbm [shape: f32[16,128], index: 2, kind: input, shape index: {}]   ;;  %s918_s3 = inlined_call_operand.hbm [shape: f32[2,8,128], index: 3, kind: output, shape index: {}]  }
   0x1   :  { %921 = sst [smem:[#allocation14_spill]] %s917_s2 }
   0x2   :  { %8 = vsyncpa [#allocation3], 0 }
   0x3   :  { %10 = vsyncpa [#allocation3 + $0x1], 0 }
   0x4   :  { %11 = vsyncpa [#allocation6], 0 }
   0x5   :  { %13 = vsyncpa [#allocation6 + $0x1], 0 }
   0x6   :  { %14 = vsyncpa [#allocation4], 0 }
   0x7   :  { %16 = vsyncpa [#allocation4 + $0x1], 0  ;;  %s736_s12 = smov 0   ;;  %s738_s13 = smov 0  }
   0x8   :  { %s740_s14 = smov 0   ;;  %s742_s15 = smov 0  }
   0x9 LB: > { %s757_s16 = sadd.s32 4294967295, %s709_s15   ;;  %s453_s17 = sadd.s32 4294967294, %s709_s15   ;;  %s709_s15 = sphi %s742_s15, %s935_s15   ;;  %s705_s14 = sphi %s740_s14, %s934_s14   ;;  %s701_s13 = sphi %s738_s13, %s933_s13   ;;  %s697_s12 = sphi %s736_s12, %s932_s12  }
   0xa   : > { %p42_p0 = scmp.ne.s32.totalorder %s701_s13, %s697_s12  ;;  %p43_p1 = scmp.eq.s32.totalorder %s757_s16, 0 }
   0xb   : > { %p113_p2 = scmp.eq.s32.totalorder %s757_s16, 1  ;;  %p119_p3 = scmp.eq.s32.totalorder %s453_s17, 1 }
   0xc   : > { %p766_p4 = por %p43_p1, %p42_p0  ;;  %p454_p5 = scmp.ge.s32.totalorder %s709_s15, 1 }
   0xd   : > { %p771_p6 = por %p119_p3, %p42_p0  ;;  %p126_p7 = scmp.lt.s32.totalorder %s709_s15, 3 }
   0xe   : > { %s924_s2 = sld [smem:[#allocation14_spill]]  ;;  %s711_s24 = smov [#allocation7]  }
   0xf   : > { %p779_p8 = pnand %p454_p5, %p126_p7  ;;  %s139_s25 = sshll.u32 %s711_s24, 4  ;;  %s140_s25 = int_to_ptr.vmem [resolvable:$true] %s139_s25 }
  0x10   : > { %s789_s26 = sadd.s32 1, %s709_s15   ;;  %s919_s27 = smov 128  }
  0x11   : > { %p489_p9 = pneg %p779_p8  ;;  %s713_s28 = smov 8  }
  0x12   : > { %s26_s29 = ssub.s32 %s709_s15, %s789_s26  ;;  %s29_s30 = sadd.s32 1, %s705_s14 }
  0x13   : > { %p490_p10 = pnand %p489_p9, %p43_p1  ;;  %p27_p12 = scmp.eq.s32.totalorder %s26_s29, 0 }
  0x14   : > { %s137_s22 = sshll.u32 %s924_s2, 4  ;;  %p36_p13 = scmp.ne.s32.totalorder %s705_s14, %s701_s13  ;;  %s138_s22 = int_to_ptr.hbm [resolvable:$true] %s137_s22 }
  0x15   : > { %492 = dma.hbm_to_vmem [thread:$0]  (!%p490_p10), %s138_s22, 256, %s140_s25, [#allocation6], %s919_s27, %s919_s27, %s713_s28  }
  0x16   : > { %p37_p0 = scmp.eq.s32.totalorder %s709_s15, 0  ;;  %p505_p3 = scmp.lt.s32.totalorder %s709_s15, 2 }
  0x17   : > { %s802_s4 = scalar_select %p27_p12, %s705_s14, %s29_s30  }
  0x18   : > { %p38_p5 = por %p37_p0, %p36_p13  ;;  %p806_p7 = por %p113_p2, %p36_p13 }
  0x19   : > { %926 = sst [smem:[#allocation13_spill]] %s802_s4  ;;  %s153_s6 = sand.u32 1, %s705_s14  }
  0x1a   : > { %s475_s7 = smul.u32 48, %s709_s15  ;;  %p815_p9 = pnand %p505_p3, %p38_p5 }
  0x1b   : > { %s474_s8 = smul.u32 48, %s153_s6  ;;  %s154_s24 = scalar_lea.sflag [#allocation3], %s153_s6 }
  0x1c   : > { %s162_s11 = scalar_lea.hbm %s915_s0, %s475_s7  ;;  %p579_p10 = pneg %p815_p9 }
  0x1d   : > { %s163_s20 = sshll.u32 %s162_s11, 4  ;;  %s157_s21 = scalar_lea.vmem [#allocation2], %s474_s8  ;;  %s164_s20 = int_to_ptr.hbm [resolvable:$true] %s163_s20 }
  0x1e   : > { %s165_s22 = sshll.u32 %s157_s21, 4  ;;  %s575_s25 = sshra.s32 %s164_s20, 4  ;;  %s166_s22 = int_to_ptr.vmem [resolvable:$true] %s165_s22  ;;  %s576_s25 = int_to_ptr.hbm [resolvable:$true] %s575_s25 }
  0x1f   : > { %s577_s29 = scalar_lea.hbm %s576_s25, 48  ;;  %s582_s10 = scalar_lea.hbm %s915_s0, 96 }
  0x20   : > { %p578_p2 = scmp.ne.s32.totalorder %s576_s25, %s577_s29  ;;  %p583_p0 = scmp.lt.s32.totalorder %s576_s25, %s915_s0 }
  0x21   : > { %p584_p3 = scmp.lt.s32.totalorder %s582_s10, %s577_s29 }
  0x22   : > { %p580_p12 = pnand %p579_p10, %p578_p2 }
  0x23   : > { %p585_p5 = por %p584_p3, %p583_p0 }
  0x24   : > { %p581_p13 = pneg %p580_p12 }
  0x26   : > { %p586_p11 = pnand %p585_p5, %p581_p13 }
  0x28   : > { %589 = shalt.err (!%p586_p11)
}
  0x29   : > { %s929_s6 = smov 128   ;;  %s175_s21 = sand.u32 1, %s709_s15  }
  0x2a   : > { %496 = dma.hbm_to_vmem [thread:$0]  (!%p815_p9), %s164_s20, 768, %s166_s22, %s154_s24, %s929_s6, %s929_s6, %s713_s28  }
  0x2b   : > { %s184_s9 = scalar_lea.hbm %s916_s1, %s475_s7  ;;  %s179_s27 = scalar_lea.vmem [#allocation5], %s474_s8 }
  0x2c   : > { %s185_s4 = sshll.u32 %s184_s9, 4  ;;  %s187_s25 = sshll.u32 %s179_s27, 4  ;;  %s186_s4 = int_to_ptr.hbm [resolvable:$true] %s185_s4  ;;  %s188_s25 = int_to_ptr.vmem [resolvable:$true] %s187_s25 }
  0x2d   : > { %s176_s29 = scalar_lea.sflag [#allocation6], %s175_s21  ;;  %s605_s10 = sshra.s32 %s186_s4, 4  ;;  %s606_s10 = int_to_ptr.hbm [resolvable:$true] %s605_s10 }
  0x2e   : > { %s607_s11 = scalar_lea.hbm %s606_s10, 48  ;;  %s612_s24 = scalar_lea.hbm %s916_s1, 96 }
  0x2f   : > { %p608_p11 = scmp.ne.s32.totalorder %s606_s10, %s607_s11  ;;  %p613_p13 = scmp.lt.s32.totalorder %s606_s10, %s916_s1 }
  0x30   : > { %p614_p0 = scmp.lt.s32.totalorder %s612_s24, %s607_s11 }
  0x31   : > { %p610_p2 = pnand %p608_p11, %p579_p10 }
  0x32   : > { %p615_p3 = por %p614_p0, %p613_p13 }
  0x33   : > { %p611_p12 = pneg %p610_p2 }
  0x35   : > { %p616_p5 = pnand %p615_p3, %p611_p12 }
  0x37   : > { %619 = shalt.err (!%p616_p5)
}
  0x38   : > { %499 = dma.hbm_to_vmem [thread:$0]  (!%p815_p9), %s186_s4, 768, %s188_s25, %s176_s29, %s929_s6, %s929_s6, %s713_s28  }
  0x39   : > { %199 = sbr.rel (%p779_p8) target bundleno = 220 (0xdc), region = 32  ;;  %s856_s8 = sand.u32 (!%p779_p8), 1, %s701_s13  }
  0x3a   : > { %s478_s21 = smul.u32 (!%p779_p8), 48, %s856_s8  ;;  %s202_s30 = scalar_lea.sflag (!%p779_p8), [#allocation3], %s856_s8 }
  0x3c   : > { %s205_s9 = scalar_lea.vmem (!%p779_p8), [#allocation2], %s478_s21 }
  0x3e   : > { %680 = dma.done.wait (%p766_p4), %s202_s30, 768  }
  0x3f   : > { %682 = vsyncadd (%p766_p4), %s202_s30, 4294966528  ;;  %s211_s28 = sand.u32 1, %s757_s16   ;;  %s215_s23 = scalar_lea.vmem [#allocation5], %s478_s21 }
  0x40   : > { %s212_s4 = scalar_lea.sflag [#allocation6], %s211_s28 }
  0x41   : > { %684 = dma.done.wait (%p766_p4), %s212_s4, 768  }
  0x42   : > { %686 = vsyncadd (%p766_p4), %s212_s4, 4294966528 }
  0x43   : > { %688 = dma.done.wait (%p43_p1), [#allocation6], 256  }
  0x44   : > { %690 = vsyncadd (%p43_p1), [#allocation6], 4294967040  ;;  %v249_v0 = vld [vmem:[%s205_s9] sm:$0xff]  ;;  %v462_v2 = vld [vmem:[%s205_s9 + $0x10] sm:$0xff]  ;;  %v287_v7 = vlaneseq  ;;  %s714_s18 = smov 127   ;;  %s715_s17 = smov 1  }
  0x45   : > { %v251_v1 = vld [vmem:[%s215_s23] sm:$0xff]  ;;  %v464_v4 = vld [vmem:[%s215_s23 + $0x10] sm:$0xff]  ;;  %v250_v10 = vld [vmem:[%s205_s9 + $0x8] sm:$0xff]  ;;  %s461_s6 = sshll.u32 %s856_s8, 3  ;;  %s471_s27 = sshll.u32 %s757_s16, 3 }
  0x46   : > { %v253_v3 = vsub.f32 %v249_v0, %v251_v1  ;;  %v466_v5 = vld [vmem:[%s205_s9 + $0x20] sm:$0xff]  ;;  %v261_v8 = vsub.f32 %v462_v2, %v464_v4  ;;  %v252_v11 = vld [vmem:[%s215_s23 + $0x8] sm:$0xff]  ;;  %v463_v12 = vld [vmem:[%s205_s9 + $0x18] sm:$0xff]  ;;  %v288_v20 = vshrl.u32 %v287_v7, 7  ;;  %s346_s10 = scalar_lea.hbm %s918_s3, %s471_s27  ;;  %s248_s11 = scalar_lea.vmem [#allocation8], %s461_s6 }
  0x47   : > { %v468_v6 = vld [vmem:[%s215_s23 + $0x20] sm:$0xff]  ;;  %v254_v13 = vsub.f32 %v250_v10, %v252_v11  ;;  %v465_v14 = vld [vmem:[%s215_s23 + $0x18] sm:$0xff]  ;;  %v467_v15 = vld [vmem:[%s205_s9 + $0x28] sm:$0xff]  ;;  %s348_s20 = sshll.u32 %s248_s11, 4  ;;  %s350_s22 = sshll.u32 %s346_s10, 4  ;;  %s349_s20 = int_to_ptr.vmem [resolvable:$true] %s348_s20  ;;  %s351_s22 = int_to_ptr.hbm [resolvable:$true] %s350_s22 }
  0x48   : > { %v271_v9 = vsub.f32 %v466_v5, %v468_v6  ;;  %v469_v16 = vld [vmem:[%s215_s23 + $0x28] sm:$0xff]  ;;  %v263_v17 = vadd.f32 %v261_v8, %v253_v3  ;;  %v262_v18 = vsub.f32 %v463_v12, %v465_v14  ;;  %vm289_vm0 = vcmp.lt.s32.totalorder %v288_v20, 1  ;;  %v329_v0 = vld [vmem:[#allocation7] sm:$0xff]  ;;  %s336_s16 = scalar_lea.sflag [#allocation4], %s856_s8  ;;  %s649_s24 = sshra.s32 %s351_s22, 4  ;;  %s650_s24 = int_to_ptr.hbm [resolvable:$true] %s649_s24 }
  0x49   : > { %v272_v19 = vsub.f32 %v467_v15, %v469_v16  ;;  %vm296_vm1 = vcmp.lt.s32.totalorder %v288_v20, 7  ;;  %v330_v1 = vld [vmem:[#allocation7 + $0x8] sm:$0xff]  ;;  %s651_s2 = scalar_lea.hbm %s650_s24, 8  ;;  %s655_s30 = scalar_lea.hbm %s918_s3, 16 }
  0x4a   : > { %v273_v21 = vadd.f32 %v271_v9, %v263_v17  ;;  %v264_v22 = vadd.f32 %v262_v18, %v254_v13  ;;  %p652_p1 = scmp.ne.s32.totalorder %s650_s24, %s651_s2  ;;  %p656_p9 = scmp.lt.s32.totalorder %s650_s24, %s918_s3 }
  0x4b   : > { %p657_p10 = scmp.lt.s32.totalorder %s655_s30, %s651_s2 }
  0x4c   : > { %279 = vrot.lane.b32.xlu1 %v273_v21, %s714_s18  ;;  %275 = vrot.lane.b32.xlu0 %v273_v21, %s715_s17  ;;  %v274_v23 = vadd.f32 %v272_v19, %v264_v22  ;;  %v303_v24 = vrot.slane %v273_v21, 7  ;;  %v307_v25 = vrot.slane %v273_v21, 1  ;;  %p653_p4 = pnand %p652_p1, %p806_p7 }
  0x4d   : > { %p658_p11 = por %p657_p10, %p656_p9 }
  0x4e   : > { %v304_v26 = vrot.slane %v274_v23, 7  ;;  %v308_v27 = vrot.slane %v274_v23, 1  ;;  %p654_p8 = pneg %p653_p4 }
  0x50   : > { %v306_v28 = vsel %vm289_vm0, %v304_v26, %v303_v24  ;;  %v309_v29 = vsel %vm296_vm1, %v307_v25, %v308_v27  ;;  %v305_v31 = vsel %vm289_vm0, %v303_v24, %v304_v26  ;;  %v310_v32 = vsel %vm296_vm1, %v308_v27, %v307_v25  ;;  %p659_p2 = pnand %p658_p11, %p654_p8 }
  0x51   : > { %v311_v30 = vsub.f32 %v306_v28, %v309_v29  ;;  %v312_v33 = vsub.f32 %v305_v31, %v310_v32 }
  0x53   : > { %313 = vrot.lane.b32.xlu2 %v311_v30, %s715_s17 }
  0x54   : > { %281 = vrot.lane.b32.xlu1 %v274_v23, %s714_s18  ;;  %277 = vrot.lane.b32.xlu0 %v274_v23, %s715_s17 }
  0x5b   : > { %315 = vrot.lane.b32.xlu2 %v312_v33, %s715_s17 }
  0x5c   : > { %319 = vrot.lane.b32.xlu0 %v311_v30, %s714_s18  ;;  %321 = vrot.lane.b32.xlu1 %v312_v33, %s714_s18 }
  0xad   : > { %v314_v34 = vpop.permute.xlu2 %313 }
  0xae   : > { %v317_v51 = vadd.f32 %v314_v34, %v311_v30 }
  0xb5   : > { %v316_v41 = vpop.permute.xlu2 %315 }
  0xb6   : > { %v318_v47 = vadd.f32 %v316_v41, %v312_v33 }
  0xbe   : > { %v280_v35 = vpop.permute.xlu1 %279  ;;  %v276_v36 = vpop.permute.xlu0 %275 }
  0xbf   : > { %v283_v37 = vsub.f32 %v276_v36, %v280_v35 }
  0xc1   : > { %v285_v42 = vrot.slane %v283_v37, 7  ;;  %v294_v45 = vrot.slane %v283_v37, 1 }
  0xc6   : > { %v282_v38 = vpop.permute.xlu1 %281  ;;  %v278_v39 = vpop.permute.xlu0 %277 }
  0xc7   : > { %v284_v40 = vsub.f32 %v278_v39, %v282_v38 }
  0xc9   : > { %v286_v43 = vrot.slane %v284_v40, 7  ;;  %v295_v44 = vrot.slane %v284_v40, 1 }
  0xcb   : > { %v290_v46 = vsel %vm289_vm0, %v285_v42, %v286_v43  ;;  %v291_v48 = vsel %vm289_vm0, %v286_v43, %v285_v42  ;;  %v297_v52 = vsel %vm296_vm1, %v294_v45, %v295_v44  ;;  %v298_v53 = vsel %vm296_vm1, %v295_v44, %v294_v45 }
  0xcc   : > { %v293_v49 = vadd.f32 %v290_v46, %v284_v40  ;;  %v292_v50 = vadd.f32 %v291_v48, %v283_v37 }
  0xce   : > { %v299_v54 = vadd.f32 %v297_v52, %v292_v50  ;;  %v320_v55 = vpop.permute.xlu0 %319  ;;  %v300_v56 = vadd.f32 %v298_v53, %v293_v49  ;;  %v322_v57 = vpop.permute.xlu1 %321 }
  0xcf   : > { %v323_v58 = vadd.f32 %v320_v55, %v317_v51  ;;  %v324_v59 = vadd.f32 %v322_v57, %v318_v47 }
  0xd0   : > { %v301_v60 = vand.u32 2147483647, %v299_v54  ;;  %v302_v61 = vand.u32 2147483647, %v300_v56 }
  0xd1   : > { %v325_v62 = vand.u32 2147483647, %v323_v58  ;;  %v326_v63 = vand.u32 2147483647, %v324_v59 }
  0xd3   : > { %v327_v2 = vadd.f32 %v325_v62, %v301_v60  ;;  %v328_v3 = vadd.f32 %v326_v63, %v302_v61 }
  0xd5   : > { %v331_v4 = vmul.f32 %v329_v0, %v327_v2  ;;  %v332_v5 = vmul.f32 %v330_v1, %v328_v3 }
  0xd7   : > { %v333_v6 = vadd.f32 %v332_v5, %v331_v4 }
  0xd9   : > { %334 = vst [vmem:[%s248_s11] sm:$0xff] %v333_v6 }
  0xda   : > { %662 = shalt.err (!%p659_p2)
}
  0xdb   : > { %487 = dma.vmem_to_hbm [thread:$0]  (%p806_p7), %s349_s20, 128, %s351_s22, %s336_s16  }
  0xdc PF: > { %s362_s8 = sand.u32 1, %s697_s12   ;;  %p930_p12 = scmp.ge.s32.totalorder %s709_s15, 2 }
  0xdd   : > { %s363_s4 = scalar_lea.sflag [#allocation4], %s362_s8 }
  0xde   : > { %p501_p13 = pnand %p930_p12, %p771_p6 }
  0xe0   : > { %p502_p0 = pneg %p501_p13 }
  0xe2   : > { %692 = dma.done.wait (%p502_p0), %s363_s4, 128  }
  0xe3   : > { %694 = vsyncadd (%p502_p0), %s363_s4, 4294967168  ;;  %s931_s23 = sld [smem:[#allocation13_spill]]  ;;  %p19_p3 = scmp.ge.s32.totalorder %s789_s26, 4  }
  0xe4   : > { %s932_s12 = smov %s701_s13  ;;  %s933_s13 = smov %s705_s14 }
  0xe5   : > { %s935_s15 = smov %s789_s26  ;;  %21 = sbr.rel (!%p19_p3) target bundleno = 9 (0x9), region = 98 }
  0xe9   : > { %s934_s14 = smov %s931_s23 }
  0xea   :  { %369 = vsyncpa [#allocation3], 1 }
  0xeb   :  { %371 = vsyncpa [#allocation3 + $0x1], 1 }
  0xec   :  { %372 = vsyncpa [#allocation6], 1 }
  0xed   :  { %374 = vsyncpa [#allocation6 + $0x1], 1 }
  0xee   :  { %375 = vsyncpa [#allocation4], 1 }
  0xef   :  { %377 = vsyncpa [#allocation4 + $0x1], 1 }

</bundles_post_ra>
